<compile_context>
chip_gen: v7x
topology: tpu7x:2x2x1
jax: 0.10.0
libtpu: 0.0.40
codegen_flags: <defaults>
</compile_context>

<pallas_src>
import functools

import jax
import jax.numpy as jnp
from jax import lax
from jax.experimental import pallas as pl
from jax.experimental.pallas import tpu as pltpu


def _round_up(a: int, b: int) -> int:
    return (a + b - 1) // b * b


def _two_layer_kernel(x_ref, w1_ref, w2_ref, out_ref, *, activation):
    # x_ref  : (TILE_N, K)       flattened top-left patch, batch on sublanes
    # w1_ref : (HIDDEN, K)       conv1 weight, flattened, PyTorch layout
    # w2_ref : (OUT, HIDDEN)     linear2 weight, PyTorch layout
    # out_ref: (TILE_N, OUT)     PyTorch output layout (no post-kernel transpose)
    x = x_ref[...]
    if x.dtype != jnp.bfloat16:
        x = x.astype(jnp.bfloat16)
    w1 = w1_ref[...]
    if w1.dtype != jnp.bfloat16:
        w1 = w1.astype(jnp.bfloat16)
    w2 = w2_ref[...]
    if w2.dtype != jnp.bfloat16:
        w2 = w2.astype(jnp.bfloat16)

    # h[n, hid] = sum_k x[n, k] * w1[hid, k]: both operands contract their
    # last dim, so the large x tile never goes through an XLU transpose /
    # VMEM re-layout; only the tiny (HIDDEN, K) weight is relaid out.
    h = lax.dot_general(
        x, w1, (((1,), (1,)), ((), ())), preferred_element_type=jnp.float32
    )
    if activation in ("sigmoid", "Sigmoid"):
        h = jax.nn.sigmoid(h)          # f32 EUP path (v5e has no bf16 EUP)
    elif activation in ("relu", "Relu"):
        h = jnp.maximum(h, 0.0)
    elif activation in ("tanh", "Tanh"):
        h = jnp.tanh(h)
    else:
        raise ValueError(f"unknown activation: {activation}")

    # out[n, o] = sum_hid h[n, hid] * w2[o, hid]  (again only tiny w2 flips).
    out = lax.dot_general(
        h.astype(jnp.bfloat16), w2, (((1,), (1,)), ((), ())),
        preferred_element_type=jnp.float32,
    )
    out_ref[...] = out.astype(out_ref.dtype)


@functools.partial(jax.jit, static_argnames=("tile_n", "activation"))
def two_layer_conv_forward(x, w1, w2, *, tile_n=2048, activation="sigmoid"):
    """Forward pass of two_layer_conv.

    x : (N, 1, H, W)  with H, W >= input_dim (only the top-left patch matters)
    w1: (hidden_dim, 1, input_dim, input_dim)  conv1.weight (PyTorch layout)
    w2: (output_dim, hidden_dim)               linear2.weight (PyTorch layout)
    returns (N, output_dim) float32
    """
    n, c, hgt, wid = x.shape
    hidden_dim, c_w, kd, kd2 = w1.shape
    output_dim, hidden_dim2 = w2.shape
    assert c == 1 and c_w == 1, "two_layer_conv expects a single input channel"
    assert kd == kd2, "conv1 kernel must be square"
    assert hidden_dim2 == hidden_dim, "linear2 in_features must equal hidden_dim"
    assert hgt >= kd and wid >= kd, "spatial dims must cover the conv kernel"
    k = kd * kd

    # conv1(x)[:, :, 0, 0] only depends on the top-left (kd, kd) patch. When
    # the input is exactly (N, 1, kd, kd) this is a pure reshape (zero-copy).
    # TODO(synk): for H, W > kd, DMA (tile_n, kd, W) blocks straight from the
    # NCHW layout and slice inside the kernel to avoid this gather pass.
    if hgt == kd and wid == kd:
        x_flat = x.reshape(n, k)
    else:
        x_flat = x[:, 0, :kd, :kd].reshape(n, k)
    w1_flat = w1.reshape(hidden_dim, k)

    # Pad N only to lane granularity (128); do NOT round up to a full tile --
    # the ragged tail is handled as a partial last block by Pallas.
    n_pad = _round_up(n, 128)
    if n_pad != n:
        x_flat = jnp.pad(x_flat, ((0, n_pad - n), (0, 0)))

    # Tile selection: large tiles amortize the ~0.35 us/step overhead, but
    # keep >=2 grid steps so both v7x TensorCores get work ("parallel" axis)
    # and the input pipeline stays double-buffered.
    tile_n = _round_up(max(128, min(tile_n, n_pad)), 128)
    if n_pad >= 2 * 128:
        tile_n = min(tile_n, _round_up(pl.cdiv(n_pad, 2), 128))
    grid_n = pl.cdiv(n_pad, tile_n)

    # Explicit scoped-VMEM budget (v5e default is only 16 MiB): double
    # buffers for the x / out tiles plus the resident weights, with headroom.
    est_bytes = (
        2 * tile_n * k * x_flat.dtype.itemsize
        + 2 * tile_n * output_dim * 4
        + 2 * hidden_dim * k * w1_flat.dtype.itemsize
        + 2 * output_dim * hidden_dim * w2.dtype.itemsize
    )
    vmem_limit = int(min(max(est_bytes + (4 << 20), 16 << 20), 56 << 20))

    out = pl.pallas_call(
        functools.partial(_two_layer_kernel, activation=activation),
        out_shape=jax.ShapeDtypeStruct((n_pad, output_dim), jnp.float32),
        grid=(grid_n,),
        in_specs=[
            pl.BlockSpec((tile_n, k), lambda i: (i, 0)),               # x tile
            pl.BlockSpec((hidden_dim, k), lambda i: (0, 0)),           # W1 resident
            pl.BlockSpec((output_dim, hidden_dim), lambda i: (0, 0)),  # W2 resident
        ],
        out_specs=pl.BlockSpec((tile_n, output_dim), lambda i: (i, 0)),
        compiler_params=pltpu.CompilerParams(
            dimension_semantics=("parallel",),
            vmem_limit_bytes=vmem_limit,
        ),
    )(x_flat, w1_flat, w2)

    # Output is already in the PyTorch (N, output_dim) layout; just drop the
    # (at most 127) padded rows.
    return out[:n] if n_pad != n else out


if __name__ == "__main__":
    # Small demo shapes consistent with the module.
    input_dim, hidden_dim, output_dim = 16, 32, 8
    n = 256

    key = jax.random.PRNGKey(0)
    kx, k1, k2 = jax.random.split(key, 3)

    # x matches nn.Conv2d(1, hidden_dim, input_dim): (N, 1, input_dim, input_dim).
    x = jax.random.normal(kx, (n, 1, input_dim, input_dim), dtype=jnp.float32)
    # torch.nn.init.normal_(weight, 0, 1) -> standard normal, PyTorch layouts.
    w1 = jax.random.normal(k1, (hidden_dim, 1, input_dim, input_dim), dtype=jnp.float32)
    w2 = jax.random.normal(k2, (output_dim, hidden_dim), dtype=jnp.float32)

    # Cast parameters to bf16 once, outside the hot path (MXU fast path; the
    # kernel also accepts f32 and casts in VMEM).
    w1_bf16 = w1.astype(jnp.bfloat16)
    w2_bf16 = w2.astype(jnp.bfloat16)

    out = two_layer_conv_forward(x, w1_bf16, w2_bf16, activation="sigmoid")
    out = jax.block_until_ready(out)

    # Pure-JAX reference with matching bf16 matmul inputs / f32 accumulation.
    xf = x[:, 0].reshape(n, input_dim * input_dim)
    w1f = w1.reshape(hidden_dim, input_dim * input_dim)
    h_ref = jax.nn.sigmoid(
        jnp.dot(xf.astype(jnp.bfloat16), w1f.astype(jnp.bfloat16).T,
                preferred_element_type=jnp.float32)
    )
    ref = jnp.dot(h_ref.astype(jnp.bfloat16), w2.astype(jnp.bfloat16).T,
                  preferred_element_type=jnp.float32)

    assert out.shape == (n, output_dim)
    assert jnp.allclose(out, ref, atol=2e-2, rtol=2e-2), float(
        jnp.max(jnp.abs(out - ref))
    )

    print("KERNEL_OK")
</pallas_src>

<mosaic_0001>
module attributes {stable_mosaic.version = 11 : i64} {
  func.func @_two_layer_kernel(%arg0: i32, %arg1: memref<128x256xf32, #tpu.memory_space<vmem>>, %arg2: memref<32x256xbf16, #tpu.memory_space<vmem>>, %arg3: memref<8x32xbf16, #tpu.memory_space<vmem>>, %arg4: memref<128x8xf32, #tpu.memory_space<vmem>>) attributes {dimension_semantics = [#tpu.dimension_semantics<parallel>], iteration_bounds = array<i64: 2>, scalar_prefetch = 0 : i64, scratch_operands = 0 : i64, tpu.core_type = #tpu.core_type<tc>, window_params = [{transform_indices = @transform_0, window_bounds = array<i64: 128, 256>}, {pipeline_mode = #tpu.pipeline_mode<synchronous>, transform_indices = @transform_1, window_bounds = array<i64: 32, 256>}, {pipeline_mode = #tpu.pipeline_mode<synchronous>, transform_indices = @transform_2, window_bounds = array<i64: 8, 32>}, {transform_indices = @transform_3, window_bounds = array<i64: 128, 8>}]} {
    %c0 = arith.constant 0 : index
    %c0_0 = arith.constant 0 : index
    %0 = vector.load %arg1[%c0, %c0_0] : memref<128x256xf32, #tpu.memory_space<vmem>>, vector<128x256xf32>
    %1 = arith.truncf %0 : vector<128x256xf32> to vector<128x256xbf16>
    %c0_1 = arith.constant 0 : index
    %c0_2 = arith.constant 0 : index
    %2 = vector.load %arg2[%c0_1, %c0_2] : memref<32x256xbf16, #tpu.memory_space<vmem>>, vector<32x256xbf16>
    %c0_3 = arith.constant 0 : index
    %c0_4 = arith.constant 0 : index
    %3 = vector.load %arg3[%c0_3, %c0_4] : memref<8x32xbf16, #tpu.memory_space<vmem>>, vector<8x32xbf16>
    %cst = arith.constant dense<0.000000e+00> : vector<128x32xf32>
    %4 = tpu.matmul %1, %2, %cst {dimension_numbers = #tpu.dot_dimension_numbers<[1], [1], [0], [0], [0, 0, 1, 0], [], []>} : vector<128x256xbf16>, vector<32x256xbf16>, vector<128x32xf32> -> vector<128x32xf32>
    %5 = arith.negf %4 : vector<128x32xf32>
    %6 = math.exp %5 : vector<128x32xf32>
    %cst_5 = arith.constant 1.000000e+00 : f32
    %7 = vector.broadcast %cst_5 : f32 to vector<128x32xf32>
    %8 = arith.addf %7, %6 : vector<128x32xf32>
    %9 = arith.divf %7, %8 : vector<128x32xf32>
    %10 = arith.truncf %9 : vector<128x32xf32> to vector<128x32xbf16>
    %cst_6 = arith.constant dense<0.000000e+00> : vector<128x8xf32>
    %11 = tpu.matmul %10, %3, %cst_6 {dimension_numbers = #tpu.dot_dimension_numbers<[1], [1], [0], [0], [0, 0, 1, 0], [], []>} : vector<128x32xbf16>, vector<8x32xbf16>, vector<128x8xf32> -> vector<128x8xf32>
    %c0_7 = arith.constant 0 : index
    %c0_8 = arith.constant 0 : index
    %12 = vector.load %arg4[%c0_7, %c0_8] : memref<128x8xf32, #tpu.memory_space<vmem>>, vector<128x8xf32>
    tpu.vector_store %arg4[%c0_7, %c0_8], %11 {strides = array<i32>} : memref<128x8xf32, #tpu.memory_space<vmem>>, vector<128x8xf32>,
    return
  }
  func.func @transform_0(%arg0: i32) -> (i32, i32) {
    %c0_i32 = arith.constant 0 : i32
    %c0_i32_0 = arith.constant 0 : i32
    return %arg0, %c0_i32 : i32, i32
  }
  func.func @transform_1(%arg0: i32) -> (i32, i32) {
    %c0_i32 = arith.constant 0 : i32
    %c0_i32_0 = arith.constant 0 : i32
    %c0_i32_1 = arith.constant 0 : i32
    return %c0_i32, %c0_i32_0 : i32, i32
  }
  func.func @transform_2(%arg0: i32) -> (i32, i32) {
    %c0_i32 = arith.constant 0 : i32
    %c0_i32_0 = arith.constant 0 : i32
    %c0_i32_1 = arith.constant 0 : i32
    return %c0_i32, %c0_i32_0 : i32, i32
  }
  func.func @transform_3(%arg0: i32) -> (i32, i32) {
    %c0_i32 = arith.constant 0 : i32
    %c0_i32_0 = arith.constant 0 : i32
    return %arg0, %c0_i32 : i32, i32
  }
}

</mosaic_0001>

<bundles_post_ra>
// kernel: two_layer_conv_forward.1
= control target key start
LH: loop header
LB: loop body
LE: loop exit
PB: predicated region body
PF: predicated region fallthrough
CT: control target
= control target key end

     0   :  { %s829_s12 = smov 0   ;;  %s949_s0 = inlined_call_operand.vmem [shape: f32[256,256], index: 0, kind: input, shape index: {}]   ;;  %s950_s1 = inlined_call_operand.vmem [shape: bf16[32,256], index: 1, kind: input, shape index: {}]   ;;  %s951_s2 = inlined_call_operand.vmem [shape: bf16[8,32], index: 2, kind: input, shape index: {}]   ;;  %s952_s3 = inlined_call_operand.vmem [shape: f32[256,8], index: 3, kind: output, shape index: {}]  }
   0x1 LB: > { %s650_s13 = sadd.s32 4294967295, %s807_s12   ;;  %p654_p0 = scmp.ge.s32.totalorder %s807_s12, 1  ;;  %s807_s12 = sphi %s829_s12, %s13_s12  }
   0x2   : > { %p139_p1 = scmp.lt.s32.totalorder %s807_s12, 3 }
   0x4   : > { %p140_p2 = pnand %p654_p0, %p139_p1 }
   0x5   : > { %v731_v0 = vld [vmem:[%s950_s1 + $0x4] ss:$8 sps:$4 sm:$0xff] (!%p140_p2)   ;;  %s655_s16 = sshll.u32 (!%p140_p2), %s650_s13, 4  ;;  %v733_v1 = vld [vmem:[%s950_s1] ss:$8 sps:$4 sm:$0xff] (!%p140_p2)   ;;  %vm452_vm0 = vcmask (!%p140_p2), 261120  }
   0x6   : > { %143 = sbr.rel (%p140_p2) target bundleno = 528 (0x210), region = 32  ;;  %p165_p3 = scmp.lt.s32.totalorder (!%p140_p2), %s655_s16, 31  ;;  %251 = vmatprep.subr.bf16.mxu0 (!%p140_p2), %v731_v0  ;;  %v734_v2 = vld [vmem:[%s950_s1 + $0x14] ss:$8 sps:$4 sm:$0xff] (!%p140_p2)   ;;  %718 = vmatprep.subr.bf16.mxu1 (!%p140_p2), %v731_v0  ;;  %v736_v3 = vld [vmem:[%s950_s1 + $0x10] ss:$8 sps:$4 sm:$0xff] (!%p140_p2)  }
   0x7   : > { %252 = vmatpush1.bf16.xpose.msra.mxu0 (!%p140_p2), %v733_v1  ;;  %720 = vmatpush1.bf16.xpose.msra.mxu1 (!%p140_p2), %v733_v1  ;;  %v230_v52 = vld [vmem:[%s951_s2] sm:$0xf] (!%p140_p2)  ;;  %vm577_vm1 = vcmask (!%p140_p2), 64512  }
   0x8   : > { %253 = vmatprep.subr.bf16.mxu0 (!%p140_p2), %v734_v2  ;;  %719 = vmatprep.subr.bf16.mxu1 (!%p140_p2), %v734_v2  ;;  %v478_v53 = vsel (!%p140_p2), %vm452_vm0, %v230_v52, 0 }
   0xd   : > { %s954_s16 = smov (!%p165_p3, %s655_s16), 31 }
   0xe   : > { %s690_s21 = sshll.u32 %s954_s16, 4  ;;  %s659_s29 = sshll.u32 %s954_s16, 3 }
   0xf   : > { %s852_s24 = scalar_lea.vmem %s949_s0, %s690_s21  ;;  %254 = vmatpush1.bf16.xpose.msra.mxu0 %v736_v3  ;;  %721 = vmatpush1.bf16.xpose.msra.mxu1 %v736_v3  ;;  %s912_s5 = scalar_lea.vmem %s952_s3, %s659_s29 }
  0x10   : > { %v179_v4 = vld [vmem:[%s852_s24 + $0x8] sm:$0xff]  ;;  %v181_v5 = vld [vmem:[%s852_s24 + $0x18] sm:$0xff]  ;;  %v178_v7 = vld [vmem:[%s852_s24] sm:$0xff]  ;;  %722 = vmatprep.subr.msk.bf16.mxu1 %vm452_vm0, %v230_v52 }
  0x11   : > { %v211_v6 = vpack.c.bf16 %v181_v5, %v179_v4  ;;  %v180_v8 = vld [vmem:[%s852_s24 + $0x10] sm:$0xff]  ;;  %v183_v9 = vld [vmem:[%s852_s24 + $0x28] sm:$0xff]  ;;  %v185_v10 = vld [vmem:[%s852_s24 + $0x38] sm:$0xff] }
  0x12   : > { %v203_v11 = vld [vmem:[%s852_s24 + $0xc8] sm:$0xff]  ;;  %v210_v12 = vpack.c.bf16 %v180_v8, %v178_v7  ;;  %v205_v13 = vld [vmem:[%s852_s24 + $0xd8] sm:$0xff]  ;;  %v202_v14 = vld [vmem:[%s852_s24 + $0xc0] sm:$0xff]  ;;  %v213_v16 = vpack.c.bf16 %v185_v10, %v183_v9 }
  0x13   : > { %283 = vmatprep.mubr.bf16.mxu0 %v211_v6  ;;  %v204_v15 = vld [vmem:[%s852_s24 + $0xd0] sm:$0xff]  ;;  %v223_v17 = vpack.c.bf16 %v205_v13, %v203_v11  ;;  %v207_v19 = vld [vmem:[%s852_s24 + $0xe8] sm:$0xff]  ;;  %v209_v20 = vld [vmem:[%s852_s24 + $0xf8] sm:$0xff] }
  0x14   : > { %v222_v18 = vpack.c.bf16 %v204_v15, %v202_v14  ;;  %v225_v21 = vpack.c.bf16 %v209_v20, %v207_v19  ;;  %v182_v22 = vld [vmem:[%s852_s24 + $0x20] sm:$0xff]  ;;  %v184_v23 = vld [vmem:[%s852_s24 + $0x30] sm:$0xff]  ;;  %v187_v26 = vld [vmem:[%s852_s24 + $0x48] sm:$0xff] }
  0x15   : > { %331 = vmatprep.mubr.bf16.mxu1 %v223_v17  ;;  %v206_v24 = vld [vmem:[%s852_s24 + $0xe0] sm:$0xff]  ;;  %v208_v25 = vld [vmem:[%s852_s24 + $0xf0] sm:$0xff]  ;;  %v189_v27 = vld [vmem:[%s852_s24 + $0x58] sm:$0xff]  ;;  %v212_v28 = vpack.c.bf16 %v184_v23, %v182_v22 }
  0x16   : > { %284 = vmatmul.mubr.bf16.vlgmr.msra.gmra.mrb[0].mxu0 %v210_v12  ;;  %332 = vmatmul.mubr.bf16.vlgmr.msra.gmra.mrb[0].mxu1 %v222_v18  ;;  %v224_v29 = vpack.c.bf16 %v208_v25, %v206_v24  ;;  %v215_v30 = vpack.c.bf16 %v189_v27, %v187_v26  ;;  %v186_v31 = vld [vmem:[%s852_s24 + $0x40] sm:$0xff]  ;;  %v188_v32 = vld [vmem:[%s852_s24 + $0x50] sm:$0xff]  ;;  %v191_v33 = vld [vmem:[%s852_s24 + $0x68] sm:$0xff] }
  0x17   : > { %291 = vmatprep.mubr.bf16.mxu0 %v213_v16  ;;  %339 = vmatprep.mubr.bf16.mxu1 %v225_v21  ;;  %v193_v34 = vld [vmem:[%s852_s24 + $0x78] sm:$0xff]  ;;  %v214_v35 = vpack.c.bf16 %v188_v32, %v186_v31  ;;  %v190_v37 = vld [vmem:[%s852_s24 + $0x60] sm:$0xff]  ;;  %v192_v38 = vld [vmem:[%s852_s24 + $0x70] sm:$0xff] }
  0x18   : > { %v217_v36 = vpack.c.bf16 %v193_v34, %v191_v33  ;;  %v195_v39 = vld [vmem:[%s852_s24 + $0x88] sm:$0xff]  ;;  %v197_v40 = vld [vmem:[%s852_s24 + $0x98] sm:$0xff]  ;;  %v216_v41 = vpack.c.bf16 %v192_v38, %v190_v37  ;;  %v194_v43 = vld [vmem:[%s852_s24 + $0x80] sm:$0xff]  ;;  %701 = vmatpush3.bf16.xpose.msra.mxu1 %v478_v53 }
  0x19   : > { %v219_v42 = vpack.c.bf16 %v197_v40, %v195_v39  ;;  %v196_v44 = vld [vmem:[%s852_s24 + $0x90] sm:$0xff]  ;;  %v199_v45 = vld [vmem:[%s852_s24 + $0xa8] sm:$0xff]  ;;  %v201_v46 = vld [vmem:[%s852_s24 + $0xb8] sm:$0xff] }
  0x1a   : > { %v218_v47 = vpack.c.bf16 %v196_v44, %v194_v43  ;;  %v221_v48 = vpack.c.bf16 %v201_v46, %v199_v45  ;;  %v198_v49 = vld [vmem:[%s852_s24 + $0xa0] sm:$0xff]  ;;  %v200_v50 = vld [vmem:[%s852_s24 + $0xb0] sm:$0xff] }
  0x1b   : > { %v220_v51 = vpack.c.bf16 %v200_v50, %v198_v49 }
  0x1e   : > { %292 = vmatmul.mubr.bf16.gmra.mrb[4].mxu0 %v212_v28  ;;  %340 = vmatmul.mubr.bf16.gmra.mrb[4].mxu1 %v224_v29 }
  0x1f   : > { %299 = vmatprep.mubr.bf16.mxu0 %v215_v30 }
  0x26   : > { %300 = vmatmul.mubr.bf16.gmra.mrb[8].mxu0 %v214_v35 }
  0x27   : > { %307 = vmatprep.mubr.bf16.mxu0 %v217_v36 }
  0x2e   : > { %308 = vmatmul.mubr.bf16.gmra.mrb[12].mxu0 %v216_v41 }
  0x2f   : > { %315 = vmatprep.mubr.bf16.mxu0 %v219_v42 }
  0x36   : > { %316 = vmatmul.mubr.bf16.gmra.mrb[16].mxu0 %v218_v47 }
  0x37   : > { %323 = vmatprep.mubr.bf16.mxu0 %v221_v48 }
  0x3e   : > { %324 = vmatmul.mubr.bf16.gmra.mrb[20].mxu0 %v220_v51 }
  0xe9   : > { %v285_v54 = vpop.f32.mrb[0].mxu0  ;;  %v333_v55 = vpop.f32.mrb[0].mxu1 }
  0xea   : > { %v664_v56 = vmul.f32 -1.442695, %v285_v54  ;;  %v287_v57 = vpop.f32.mrb[1].mxu0  ;;  %v676_v58 = vmul.f32 -1.442695, %v333_v55  ;;  %v335_v59 = vpop.f32.mrb[1].mxu1 }
  0xeb   : > { %v288_v60 = vpop.f32.mrb[2].mxu0  ;;  %v336_v61 = vpop.f32.mrb[2].mxu1 }
  0xec   : > { %737 = vpow2.f32 %v664_v56  ;;  %v665_v62 = vmul.f32 -1.442695, %v288_v60  ;;  %v290_v63 = vpop.f32.mrb[3].mxu0  ;;  %v677_v0 = vmul.f32 -1.442695, %v336_v61  ;;  %v338_v1 = vpop.f32.mrb[3].mxu1 }
  0xed   : > { %739 = vpow2.f32 %v676_v58 }
  0xee   : > { %741 = vpow2.f32 %v665_v62 }
  0xef   : > { %743 = vpow2.f32 %v677_v0 }
  0xf1   : > { %v293_v2 = vpop.f32.mrb[4].mxu0  ;;  %v341_v3 = vpop.f32.mrb[4].mxu1 }
  0xf2   : > { %v666_v4 = vmul.f32 -1.442695, %v293_v2  ;;  %v295_v5 = vpop.f32.mrb[5].mxu0  ;;  %v678_v6 = vmul.f32 -1.442695, %v341_v3  ;;  %v343_v7 = vpop.f32.mrb[5].mxu1 }
  0xf3   : > { %v296_v8 = vpop.f32.mrb[6].mxu0  ;;  %v344_v9 = vpop.f32.mrb[6].mxu1 }
  0xf4   : > { %745 = vpow2.f32 %v666_v4  ;;  %v667_v10 = vmul.f32 -1.442695, %v296_v8  ;;  %v298_v11 = vpop.f32.mrb[7].mxu0  ;;  %v679_v12 = vmul.f32 -1.442695, %v344_v9  ;;  %v346_v13 = vpop.f32.mrb[7].mxu1 }
  0xf5   : > { %747 = vpow2.f32 %v678_v6 }
  0xf6   : > { %v738_v14 = vpop.eup %737  ;;  %749 = vpow2.f32 %v667_v10 }
  0xf7   : > { %v740_v15 = vpop.eup %739  ;;  %v396_v16 = vadd.f32 1.0, %v738_v14  ;;  %751 = vpow2.f32 %v679_v12 }
  0xf8   : > { %v742_v17 = vpop.eup %741  ;;  %v408_v18 = vadd.f32 1.0, %v740_v15 }
  0xf9   : > { %v744_v19 = vpop.eup %743  ;;  %753 = vrcp.f32 %v396_v16  ;;  %v397_v20 = vadd.f32 1.0, %v742_v17  ;;  %v301_v21 = vpop.f32.mrb[8].mxu0 }
  0xfa   : > { %v668_v22 = vmul.f32 -1.442695, %v301_v21  ;;  %v303_v23 = vpop.f32.mrb[9].mxu0  ;;  %755 = vrcp.f32 %v408_v18  ;;  %v409_v24 = vadd.f32 1.0, %v744_v19 }
  0xfb   : > { %757 = vrcp.f32 %v397_v20  ;;  %v304_v25 = vpop.f32.mrb[10].mxu0 }
  0xfc   : > { %759 = vpow2.f32 %v668_v22  ;;  %v669_v26 = vmul.f32 -1.442695, %v304_v25  ;;  %v306_v27 = vpop.f32.mrb[11].mxu0 }
  0xfd   : > { %761 = vrcp.f32 %v409_v24 }
  0xfe   : > { %v746_v28 = vpop.eup %745  ;;  %763 = vpow2.f32 %v669_v26 }
  0xff   : > { %v748_v29 = vpop.eup %747  ;;  %v398_v30 = vadd.f32 1.0, %v746_v28 }
 0x100   : > { %v750_v31 = vpop.eup %749  ;;  %v410_v32 = vadd.f32 1.0, %v748_v29 }
 0x101   : > { %v752_v33 = vpop.eup %751  ;;  %765 = vrcp.f32 %v398_v30  ;;  %v399_v34 = vadd.f32 1.0, %v750_v31  ;;  %v309_v35 = vpop.f32.mrb[12].mxu0 }
 0x102   : > { %v670_v36 = vmul.f32 -1.442695, %v309_v35  ;;  %v311_v37 = vpop.f32.mrb[13].mxu0  ;;  %767 = vrcp.f32 %v410_v32  ;;  %v411_v38 = vadd.f32 1.0, %v752_v33 }
 0x103   : > { %v754_v39 = vpop.eup %753  ;;  %769 = vrcp.f32 %v399_v34  ;;  %v312_v40 = vpop.f32.mrb[14].mxu0 }
 0x104   : > { %v894_v41 = vpop.eup %755  ;;  %771 = vpow2.f32 %v670_v36  ;;  %v671_v42 = vmul.f32 -1.442695, %v312_v40  ;;  %v314_v43 = vpop.f32.mrb[15].mxu0 }
 0x105   : > { %v758_v44 = vpop.eup %757  ;;  %773 = vrcp.f32 %v411_v38 }
 0x106   : > { %v760_v45 = vpop.eup %759  ;;  %775 = vpow2.f32 %v671_v42  ;;  %v444_v46 = vpack.c.bf16 %v758_v44, %v754_v39 }
 0x107   : > { %v896_v47 = vpop.eup %761  ;;  %v400_v48 = vadd.f32 1.0, %v760_v45 }
 0x108   : > { %v764_v49 = vpop.eup %763  ;;  %702 = vmatprep.mubr.msk.bf16.mxu1 %vm452_vm0, %v444_v46  ;;  %v450_v50 = vpack.c.bf16 %v896_v47, %v894_v41 }
 0x109   : > { %v401_v51 = vadd.f32 1.0, %v764_v49  ;;  %v317_v52 = vpop.f32.mrb[16].mxu0  ;;  %777 = vrcp.f32 %v400_v48 }
 0x10a   : > { %v672_v53 = vmul.f32 -1.442695, %v317_v52  ;;  %v319_v54 = vpop.f32.mrb[17].mxu0 }
 0x10b   : > { %v766_v55 = vpop.eup %765  ;;  %779 = vrcp.f32 %v401_v51  ;;  %v320_v56 = vpop.f32.mrb[18].mxu0 }
 0x10c   : > { %v768_v57 = vpop.eup %767  ;;  %781 = vpow2.f32 %v672_v53  ;;  %v673_v58 = vmul.f32 -1.442695, %v320_v56  ;;  %v322_v59 = vpop.f32.mrb[19].mxu0 }
 0x10d   : > { %v770_v60 = vpop.eup %769 }
 0x10e   : > { %v772_v61 = vpop.eup %771  ;;  %v445_v62 = vpack.c.bf16 %v770_v60, %v766_v55  ;;  %783 = vpow2.f32 %v673_v58 }
 0x10f   : > { %v774_v63 = vpop.eup %773  ;;  %v402_v0 = vadd.f32 1.0, %v772_v61 }
 0x110   : > { %v776_v1 = vpop.eup %775  ;;  %703 = vmatmul.mubr.msk.bf16.vlgmr.msra.gmra.mrb[8].mxu1 %vm452_vm0, %v445_v62  ;;  %v451_v2 = vpack.c.bf16 %v774_v63, %v768_v57 }
 0x111   : > { %v403_v3 = vadd.f32 1.0, %v776_v1  ;;  %v325_v4 = vpop.f32.mrb[20].mxu0  ;;  %785 = vrcp.f32 %v402_v0 }
 0x112   : > { %v674_v5 = vmul.f32 -1.442695, %v325_v4  ;;  %v327_v6 = vpop.f32.mrb[21].mxu0 }
 0x113   : > { %787 = vrcp.f32 %v403_v3  ;;  %v328_v7 = vpop.f32.mrb[22].mxu0  ;;  %v778_v8 = vpop.eup %777 }
 0x114   : > { %789 = vpow2.f32 %v674_v5  ;;  %v675_v9 = vmul.f32 -1.442695, %v328_v7  ;;  %v330_v10 = vpop.f32.mrb[23].mxu0 }
 0x115   : > { %v780_v11 = vpop.eup %779 }
 0x116   : > { %v782_v12 = vpop.eup %781  ;;  %791 = vpow2.f32 %v675_v9  ;;  %v446_v13 = vpack.c.bf16 %v780_v11, %v778_v8 }
 0x117   : > { %v404_v14 = vadd.f32 1.0, %v782_v12 }
 0x118   : > { %v784_v15 = vpop.eup %783  ;;  %706 = vmatprep.mubr.msk.bf16.mxu1 %vm452_vm0, %v446_v13 }
 0x119   : > { %v405_v16 = vadd.f32 1.0, %v784_v15  ;;  %793 = vrcp.f32 %v404_v14 }
 0x11b   : > { %795 = vrcp.f32 %v405_v16  ;;  %v786_v17 = vpop.eup %785 }
 0x11d   : > { %v788_v18 = vpop.eup %787 }
 0x11e   : > { %v790_v19 = vpop.eup %789  ;;  %v447_v20 = vpack.c.bf16 %v788_v18, %v786_v17 }
 0x11f   : > { %v406_v21 = vadd.f32 1.0, %v790_v19 }
 0x120   : > { %v792_v22 = vpop.eup %791  ;;  %707 = vmatmul.mubr.msk.bf16.gmra.mrb[12].mxu1 %vm452_vm0, %v447_v20 }
 0x121   : > { %v407_v23 = vadd.f32 1.0, %v792_v22  ;;  %797 = vrcp.f32 %v406_v21 }
 0x123   : > { %799 = vrcp.f32 %v407_v23  ;;  %v794_v24 = vpop.eup %793 }
 0x125   : > { %v796_v25 = vpop.eup %795 }
 0x126   : > { %v448_v26 = vpack.c.bf16 %v796_v25, %v794_v24 }
 0x128   : > { %710 = vmatprep.mubr.msk.bf16.mxu1 %vm452_vm0, %v448_v26 }
 0x12b   : > { %v798_v27 = vpop.eup %797 }
 0x12d   : > { %v800_v28 = vpop.eup %799 }
 0x12e   : > { %v449_v29 = vpack.c.bf16 %v800_v28, %v798_v27 }
 0x130   : > { %711 = vmatmul.mubr.msk.bf16.gmra.mrb[16].mxu1 %vm452_vm0, %v449_v29 }
 0x131   : > { %714 = vmatprep.mubr.msk.bf16.mxu1 %vm452_vm0, %v450_v50 }
 0x138   : > { %715 = vmatmul.mubr.msk.bf16.gmra.mrb[20].mxu1 %vm452_vm0, %v451_v2 }
 0x1e3   : > { %v704_v30 = vpop.f32.mrb[8].mxu1 }
 0x1e4   : > { %580 = vst.msk [vmem:[%s912_s5 + $0x10] sm:$0xff] %vm577_vm1, %v704_v30  ;;  %v514_v31 = vpop.f32.mrb[9].mxu1 }
 0x1e5   : > { %578 = vst.msk [vmem:[%s912_s5] sm:$0xff] %vm577_vm1, %v514_v31  ;;  %v705_v32 = vpop.f32.mrb[10].mxu1 }
 0x1e6   : > { %581 = vst.msk [vmem:[%s912_s5 + $0x18] sm:$0xff] %vm577_vm1, %v705_v32  ;;  %v517_v33 = vpop.f32.mrb[11].mxu1 }
 0x1e7   : > { %579 = vst.msk [vmem:[%s912_s5 + $0x8] sm:$0xff] %vm577_vm1, %v517_v33 }
 0x1f3   : > { %v708_v34 = vpop.f32.mrb[12].mxu1 }
 0x1f4   : > { %584 = vst.msk [vmem:[%s912_s5 + $0x30] sm:$0xff] %vm577_vm1, %v708_v34  ;;  %v530_v35 = vpop.f32.mrb[13].mxu1 }
 0x1f5   : > { %582 = vst.msk [vmem:[%s912_s5 + $0x20] sm:$0xff] %vm577_vm1, %v530_v35  ;;  %v709_v36 = vpop.f32.mrb[14].mxu1 }
 0x1f6   : > { %585 = vst.msk [vmem:[%s912_s5 + $0x38] sm:$0xff] %vm577_vm1, %v709_v36  ;;  %v533_v37 = vpop.f32.mrb[15].mxu1 }
 0x1f7   : > { %583 = vst.msk [vmem:[%s912_s5 + $0x28] sm:$0xff] %vm577_vm1, %v533_v37 }
 0x203   : > { %v712_v38 = vpop.f32.mrb[16].mxu1 }
 0x204   : > { %588 = vst.msk [vmem:[%s912_s5 + $0x50] sm:$0xff] %vm577_vm1, %v712_v38  ;;  %v546_v39 = vpop.f32.mrb[17].mxu1 }
 0x205   : > { %586 = vst.msk [vmem:[%s912_s5 + $0x40] sm:$0xff] %vm577_vm1, %v546_v39  ;;  %v713_v40 = vpop.f32.mrb[18].mxu1 }
 0x206   : > { %589 = vst.msk [vmem:[%s912_s5 + $0x58] sm:$0xff] %vm577_vm1, %v713_v40  ;;  %v549_v41 = vpop.f32.mrb[19].mxu1 }
 0x207   : > { %587 = vst.msk [vmem:[%s912_s5 + $0x48] sm:$0xff] %vm577_vm1, %v549_v41 }
 0x20b   : > { %v716_v42 = vpop.f32.mrb[20].mxu1 }
 0x20c   : > { %592 = vst.msk [vmem:[%s912_s5 + $0x70] sm:$0xff] %vm577_vm1, %v716_v42  ;;  %v562_v43 = vpop.f32.mrb[21].mxu1 }
 0x20d   : > { %590 = vst.msk [vmem:[%s912_s5 + $0x60] sm:$0xff] %vm577_vm1, %v562_v43  ;;  %v717_v44 = vpop.f32.mrb[22].mxu1 }
 0x20e   : > { %593 = vst.msk [vmem:[%s912_s5 + $0x78] sm:$0xff] %vm577_vm1, %v717_v44  ;;  %v565_v45 = vpop.f32.mrb[23].mxu1 }
 0x20f   : > { %591 = vst.msk [vmem:[%s912_s5 + $0x68] sm:$0xff] %vm577_vm1, %v565_v45 }
 0x210 PF: > { %s13_s12 = sadd.s32 1, %s807_s12  }
 0x211   : > { %p10_p4 = scmp.ge.s32.totalorder %s13_s12, 4  }
 0x213   :  { %12 = sbr.rel (!%p10_p4) target bundleno = 1 (0x1), region = 62 }

</bundles_post_ra>
